<compile_context>
chip_gen: v7x
topology: tpu7x:2x2x1
jax: 0.10.0
libtpu: 0.0.40
codegen_flags: <defaults>
</compile_context>

<pallas_src>
import jax
import jax.numpy as jnp
from jax.experimental import pallas as pl
from jax.experimental.pallas import tpu as pltpu


# ---------------------------------------------------------------------------
# Parameter setup (plain JAX glue, mirrors the PyTorch __init__)
# ---------------------------------------------------------------------------
def gram_schmidt(vectors):
    """vectors: (n, d) float32 with n <= d. Returns orthonormalized rows (n, d).

    Single QR (sign-fixed so it matches classical Gram-Schmidt up to numerics)
    instead of an O(n^2) unrolled Python loop.
    """
    q, r = jnp.linalg.qr(vectors.T)                 # q: (d, n)
    sign = jnp.sign(jnp.diagonal(r))
    sign = jnp.where(sign == 0, 1.0, sign)
    return (q * sign[None, :]).T.astype(jnp.float32)


def initialize_orthogonal_filters(key, c, h, w):
    """Returns a (c, h, w) float32 filter bank (orthonormal per (h*w)-block,
    matching the PyTorch original)."""
    if h * w < c:
        if c % (h * w) != 0:
            raise ValueError(
                f"c must be divisible by h*w when h*w < c (got c={c}, h*w={h*w})")
        n = c // (h * w)
        keys = jax.random.split(key, n)
        chunks = [
            gram_schmidt(
                jax.random.uniform(keys[i], (h * w, h * w), dtype=jnp.float32))
            for i in range(n)
        ]
        flat = jnp.concatenate(chunks, axis=0)
    else:
        rnd = jax.random.uniform(key, (c, h * w), dtype=jnp.float32)
        flat = gram_schmidt(rnd)
    return flat.reshape(-1, h, w)[:c]


# ---------------------------------------------------------------------------
# Pallas kernels: out[b, c] = sum_hw filter[c, hw] * x[b, c, hw]
# ---------------------------------------------------------------------------
def _gram_proj_kernel_single(x_ref, f_ref, o_ref):
    # Single HW tile: no reduction carry needed.
    x = x_ref[...].astype(jnp.float32)          # in-kernel upcast, f32 accumulate
    f = f_ref[...].astype(jnp.float32)
    o_ref[...] = jnp.sum(x * f[None, :, :], axis=-1)


def _gram_proj_kernel_acc(x_ref, f_ref, o_ref):
    # HW-tiled reduction: output block (TB, TC) stays resident across the
    # innermost "arbitrary" hw axis and is accumulated in f32.
    x = x_ref[...].astype(jnp.float32)
    f = f_ref[...].astype(jnp.float32)
    partial = jnp.sum(x * f[None, :, :], axis=-1)
    hwi = pl.program_id(2)

    @pl.when(hwi == 0)
    def _():
        o_ref[...] = partial

    @pl.when(hwi > 0)
    def _():
        o_ref[...] += partial


# ---------------------------------------------------------------------------
# Tiling helpers
# ---------------------------------------------------------------------------
def _divisor_candidates(n, align):
    """Divisors of n that are multiples of `align`; falls back to [n]."""
    cands = [d for d in range(align, n + 1, align) if n % d == 0]
    return cands if cands else [n]


def _hw_params():
    """Generation-aware (target_x_tile_bytes, vmem_limit_bytes)."""
    try:
        vmem_cap = int(pltpu.get_tpu_info().vmem_capacity_bytes)
    except Exception:
        vmem_cap = 64 * 1024 * 1024          # conservative (v7x per-TC size)
    if vmem_cap > 64 * 1024 * 1024:          # v5e / v6e: 128 MiB physical VMEM
        return 8 * 1024 * 1024, 48 * 1024 * 1024
    return 4 * 1024 * 1024, 32 * 1024 * 1024  # v7x: stay conservative


def _choose_tiles(B, C, HW, x_elem_bytes, f_elem_bytes, *,
                  target_x_tile_bytes, max_filter_tile_bytes):
    """Pick (TB, TC, THW) obeying TPU block constraints:
         TC : multiple of 128 dividing C, or C (output lane dim),
         TB : multiple of 8  dividing B, or B (output sublane dim),
         THW: multiple of 128 dividing HW, or HW.
       Sized so tiles stay within the byte budgets, then shrunk (TB first) so
       the two parallel grid axes have >= 2 points when splittable (megacore)."""
    tb_cands = _divisor_candidates(B, 8)
    tc_cands = _divisor_candidates(C, 128)
    thw_cands = _divisor_candidates(HW, 128) if HW % 128 == 0 else [HW]
    TB_min, TC_min = min(tb_cands), min(tc_cands)

    def x_bytes(tb, tc, thw):
        return tb * tc * thw * x_elem_bytes

    def f_bytes(tc, thw):
        return tc * thw * f_elem_bytes

    # 1) THW: largest candidate whose *minimal* x tile still fits the target.
    fit = [t for t in thw_cands
           if x_bytes(TB_min, TC_min, t) <= target_x_tile_bytes
           and f_bytes(TC_min, t) <= max_filter_tile_bytes]
    THW = max(fit) if fit else min(thw_cands)

    # 2) TC: largest candidate keeping the filter tile and minimal x tile in budget.
    fit = [t for t in tc_cands
           if x_bytes(TB_min, t, THW) <= target_x_tile_bytes
           and f_bytes(t, THW) <= max_filter_tile_bytes]
    TC = max(fit) if fit else TC_min

    # 3) TB: largest candidate keeping the x tile in budget.
    fit = [t for t in tb_cands if x_bytes(t, TC, THW) <= target_x_tile_bytes]
    TB = max(fit) if fit else min(tb_cands)

    # 4) Megacore: guarantee >= 2 grid points along the parallel axes when possible.
    if (B // TB) * (C // TC) < 2:
        smaller_tb = [t for t in tb_cands if t < TB]
        smaller_tc = [t for t in tc_cands if t < TC]
        if smaller_tb:
            TB = max(smaller_tb)
        elif smaller_tc:
            TC = max(smaller_tc)
    return TB, TC, THW


# ---------------------------------------------------------------------------
# Forward wrapper
# ---------------------------------------------------------------------------
def gram_schmidt_transform(x, constant_filter, *, filter_in_x_dtype=False,
                           target_x_tile_bytes=None, vmem_limit_bytes=None):
    """x: (B, C, h, w) in its native dtype; constant_filter: (C, H, W) f32.
    Returns (B, C, 1, 1) float32 (matches PyTorch f32-buffer * input promotion)."""
    B, C, h, w = x.shape
    Cf, H, W = constant_filter.shape
    assert Cf == C

    if (h, w) != (H, W):
        # adaptive_avg_pool2d, evenly-divisible case (reshape-mean).
        # TODO(synk): general (non-divisible) adaptive_avg_pool2d not implemented.
        assert h % H == 0 and w % W == 0
        x = x.reshape(B, C, H, h // H, W, w // W).mean(axis=(3, 5))

    default_target, default_vmem = _hw_params()
    if target_x_tile_bytes is None:
        target_x_tile_bytes = default_target
    if vmem_limit_bytes is None:
        vmem_limit_bytes = default_vmem

    HW = H * W
    # Keep x in its native dtype (no wrapper upcast); the kernel casts to f32.
    x_flat = x.reshape(B, C, HW)
    f_dtype = x.dtype if (filter_in_x_dtype and x.dtype != jnp.float32) else jnp.float32
    f_flat = constant_filter.reshape(C, HW).astype(f_dtype)

    x_elem = x_flat.dtype.itemsize
    f_elem = f_flat.dtype.itemsize

    # Zero-pad HW to a multiple of 128 only when the spatial axis must be tiled
    # but is not 128-divisible (filter pad is zero -> the sum is unchanged).
    # Costs one extra HBM pass of x; acceptable vs. failing to fit in VMEM.
    tb_min = min(_divisor_candidates(B, 8))
    tc_min = min(_divisor_candidates(C, 128))
    needs_hw_tiling = tb_min * tc_min * HW * x_elem > target_x_tile_bytes
    if needs_hw_tiling and HW % 128 != 0:
        hw_pad = (-HW) % 128
        x_flat = jnp.pad(x_flat, ((0, 0), (0, 0), (0, hw_pad)))
        f_flat = jnp.pad(f_flat, ((0, 0), (0, hw_pad)))
        HW += hw_pad

    TB, TC, THW = _choose_tiles(
        B, C, HW, x_elem, f_elem,
        target_x_tile_bytes=target_x_tile_bytes,
        max_filter_tile_bytes=2 * 1024 * 1024)
    n_hw = HW // THW
    kernel = _gram_proj_kernel_single if n_hw == 1 else _gram_proj_kernel_acc

    cost = pl.CostEstimate(
        flops=2 * B * C * HW,
        transcendentals=0,
        bytes_accessed=B * C * HW * x_elem + C * HW * f_elem + B * C * 4)

    out = pl.pallas_call(
        kernel,
        out_shape=jax.ShapeDtypeStruct((B, C), jnp.float32),
        # Grid: (C-tiles, B-tiles, HW-tiles). HW is the innermost reduction axis;
        # when n_hw == 1 the filter block index is constant across the inner
        # batch axis, so the filter tile is not re-DMA'd per step.
        grid=(C // TC, B // TB, n_hw),
        in_specs=[
            pl.BlockSpec((TB, TC, THW), lambda ci, bi, hwi: (bi, ci, hwi)),
            pl.BlockSpec((TC, THW), lambda ci, bi, hwi: (ci, hwi)),
        ],
        out_specs=pl.BlockSpec((TB, TC), lambda ci, bi, hwi: (bi, ci)),
        compiler_params=pltpu.CompilerParams(
            dimension_semantics=("parallel", "parallel", "arbitrary"),
            vmem_limit_bytes=vmem_limit_bytes,
        ),
        cost_estimate=cost,
    )(x_flat, f_flat)

    return out.reshape(B, C, 1, 1)


# ---------------------------------------------------------------------------
# Demo / correctness check
# ---------------------------------------------------------------------------
if __name__ == "__main__":
    key = jax.random.PRNGKey(0)
    k_filter, k_x = jax.random.split(key)

    B, C, H = 2, 4, 16  # small shapes consistent with the module
    constant_filter = initialize_orthogonal_filters(k_filter, C, H, H)  # (C, H, H)
    x = jax.random.normal(k_x, (B, C, H, H), dtype=jnp.float32)
    ref = jnp.sum(constant_filter[None] * x, axis=(-1, -2), keepdims=True)

    # 1) f32 input, single-HW-tile fast path.
    out = jax.block_until_ready(gram_schmidt_transform(x, constant_filter))
    assert out.shape == (B, C, 1, 1)
    assert jnp.allclose(out, ref, atol=1e-5, rtol=1e-5)

    # 2) Native-bf16 streaming path (in-kernel f32 cast / accumulation).
    x_bf16 = x.astype(jnp.bfloat16)
    ref_bf = jnp.sum(constant_filter[None] * x_bf16.astype(jnp.float32),
                     axis=(-1, -2), keepdims=True)
    out_bf = jax.block_until_ready(gram_schmidt_transform(x_bf16, constant_filter))
    assert jnp.allclose(out_bf, ref_bf, atol=1e-4, rtol=1e-4)

    # 3) bf16 input with bf16-streamed filter (optional reduced-bandwidth mode).
    f_bf = constant_filter.astype(jnp.bfloat16).astype(jnp.float32)
    ref_bf2 = jnp.sum(f_bf[None] * x_bf16.astype(jnp.float32),
                      axis=(-1, -2), keepdims=True)
    out_bf2 = jax.block_until_ready(
        gram_schmidt_transform(x_bf16, constant_filter, filter_in_x_dtype=True))
    assert jnp.allclose(out_bf2, ref_bf2, atol=1e-3, rtol=1e-3)

    # 4) Force the HW-tiled reduction path (accumulating kernel, "arbitrary" axis).
    out_tiled = jax.block_until_ready(
        gram_schmidt_transform(x, constant_filter, target_x_tile_bytes=4096))
    assert jnp.allclose(out_tiled, ref, atol=1e-5, rtol=1e-5)

    print("KERNEL_OK")
</pallas_src>

<mosaic_0001>
module attributes {stable_mosaic.version = 11 : i64} {
  func.func @_gram_proj_kernel_single(%arg0: i32, %arg1: i32, %arg2: i32, %arg3: memref<2x4x256xf32, #tpu.memory_space<vmem>>, %arg4: memref<4x256xf32, #tpu.memory_space<vmem>>, %arg5: memref<2x4xf32, #tpu.memory_space<vmem>>) attributes {dimension_semantics = [#tpu.dimension_semantics<parallel>, #tpu.dimension_semantics<parallel>, #tpu.dimension_semantics<arbitrary>], iteration_bounds = array<i64: 1, 1, 1>, scalar_prefetch = 0 : i64, scratch_operands = 0 : i64, tpu.core_type = #tpu.core_type<tc>, window_params = [{transform_indices = @transform_0, window_bounds = array<i64: 2, 4, 256>}, {transform_indices = @transform_1, window_bounds = array<i64: 4, 256>}, {transform_indices = @transform_2, window_bounds = array<i64: 2, 4>}]} {
    %c0 = arith.constant 0 : index
    %c0_0 = arith.constant 0 : index
    %c0_1 = arith.constant 0 : index
    %0 = vector.load %arg3[%c0, %c0_0, %c0_1] : memref<2x4x256xf32, #tpu.memory_space<vmem>>, vector<2x4x256xf32>
    %c0_2 = arith.constant 0 : index
    %c0_3 = arith.constant 0 : index
    %1 = vector.load %arg4[%c0_2, %c0_3] : memref<4x256xf32, #tpu.memory_space<vmem>>, vector<4x256xf32>
    %2 = vector.shape_cast %1 : vector<4x256xf32> to vector<1x4x256xf32>
    %3 = vector.broadcast %2 : vector<1x4x256xf32> to vector<2x4x256xf32>
    %4 = arith.mulf %0, %3 : vector<2x4x256xf32>
    %cst = arith.constant dense<0.000000e+00> : vector<2x4xf32>
    %5 = vector.multi_reduction <add>, %4, %cst [2] : vector<2x4x256xf32> to vector<2x4xf32>
    %c0_4 = arith.constant 0 : index
    %c0_5 = arith.constant 0 : index
    %6 = vector.load %arg5[%c0_4, %c0_5] : memref<2x4xf32, #tpu.memory_space<vmem>>, vector<2x4xf32>
    tpu.vector_store %arg5[%c0_4, %c0_5], %5 {strides = array<i32>} : memref<2x4xf32, #tpu.memory_space<vmem>>, vector<2x4xf32>,
    return
  }
  func.func @transform_0(%arg0: i32, %arg1: i32, %arg2: i32) -> (i32, i32, i32) {
    %c0_i32 = arith.constant 0 : i32
    return %arg1, %arg0, %arg2 : i32, i32, i32
  }
  func.func @transform_1(%arg0: i32, %arg1: i32, %arg2: i32) -> (i32, i32) {
    %c0_i32 = arith.constant 0 : i32
    return %arg0, %arg2 : i32, i32
  }
  func.func @transform_2(%arg0: i32, %arg1: i32, %arg2: i32) -> (i32, i32) {
    %c0_i32 = arith.constant 0 : i32
    return %arg1, %arg0 : i32, i32
  }
}

</mosaic_0001>

<bundles_post_ra>
// kernel: tpu_custom_call.1
= control target key start
LH: loop header
LB: loop body
LE: loop exit
PB: predicated region body
PF: predicated region fallthrough
CT: control target
= control target key end

     0   :  { %7 = vsyncpa [#allocation3], 0  ;;  %s226_s0 = inlined_call_operand.hbm [shape: f32[2,4,256], index: 0, kind: input, shape index: {}]   ;;  %s227_s1 = inlined_call_operand.hbm [shape: f32[4,256], index: 1, kind: input, shape index: {}]   ;;  %s228_s2 = inlined_call_operand.hbm [shape: f32[2,4], index: 2, kind: output, shape index: {}]  }
   0x1   :  { %8 = vsyncpa [#allocation6], 0 }
   0x2   :  { %9 = vsyncpa [#allocation4], 0  ;;  %s170_s9 = smov [#allocation2]   ;;  %s98_s13 = scalar_lea.hbm %s226_s0, 256 }
   0x3   :  { %s15_s10 = sshll.u32 %s170_s9, 4  ;;  %p99_p0 = scmp.ne.s32.totalorder %s226_s0, %s98_s13  ;;  %s16_s10 = int_to_ptr.vmem [resolvable:$true] %s15_s10 }
   0x4   :  { %p102_p1 = scmp.lt.u32.totalorder %s98_s13, %s226_s0 }
   0x6   :  { %p104_p2 = pnand %p102_p1, %p99_p0 }
   0x8   :  { %107 = shalt.err (!%p104_p2)
}
   0x9   :  { %s108_s18 = scalar_lea.vmem %s16_s10, 256  ;;  %p113_p4 = scmp.lt.s32.totalorder %s16_s10, %s16_s10 }
   0xa   :  { %p109_p3 = scmp.ne.s32.totalorder %s16_s10, %s108_s18  ;;  %p114_p5 = scmp.lt.s32.totalorder %s108_s18, %s108_s18 }
   0xc   :  { %p115_p6 = por %p114_p5, %p113_p4 }
   0xe   :  { %p116_p7 = pnand %p115_p6, %p109_p3 }
  0x10   :  { %119 = shalt.err (!%p116_p7)
}
  0x11   :  { %s171_s19 = smov 128   ;;  %s172_s20 = smov 8  }
  0x12   :  { %21 = dma.hbm_to_vmem [thread:$0]  %s226_s0, 256, %s16_s10, [#allocation3], %s171_s19, %s171_s19, %s172_s20  }
  0x13   :  { %s173_s23 = smov [#allocation5]   ;;  %s120_s27 = scalar_lea.hbm %s227_s1, 128 }
  0x14   :  { %s28_s24 = sshll.u32 %s173_s23, 4  ;;  %p121_p8 = scmp.ne.s32.totalorder %s227_s1, %s120_s27  ;;  %s29_s24 = int_to_ptr.vmem [resolvable:$true] %s28_s24 }
  0x15   :  { %p124_p9 = scmp.lt.u32.totalorder %s120_s27, %s227_s1 }
  0x17   :  { %p126_p10 = pnand %p124_p9, %p121_p8 }
  0x19   :  { %129 = shalt.err (!%p126_p10)
}
  0x1a   :  { %s130_s4 = scalar_lea.vmem %s29_s24, 128  ;;  %p135_p12 = scmp.lt.s32.totalorder %s29_s24, %s29_s24 }
  0x1b   :  { %p131_p11 = scmp.ne.s32.totalorder %s29_s24, %s130_s4  ;;  %p136_p13 = scmp.lt.s32.totalorder %s130_s4, %s130_s4 }
  0x1d   :  { %p137_p0 = por %p136_p13, %p135_p12 }
  0x1f   :  { %p138_p1 = pnand %p137_p0, %p131_p11 }
  0x21   :  { %141 = shalt.err (!%p138_p1)
}
  0x22   :  { %31 = dma.hbm_to_vmem [thread:$0]  %s227_s1, 128, %s29_s24, [#allocation6]  }
  0x23   :  { %164 = dma.done.wait [#allocation3], 256  }
  0x24   :  { %165 = vsyncadd [#allocation3], 4294967040 }
  0x25   :  { %166 = dma.done.wait [#allocation6], 128  }
  0x26   :  { %167 = vsyncadd [#allocation6], 4294967168  ;;  %v38_v0 = vld [vmem:[#allocation2] sm:$0xff]  ;;  %v40_v1 = vld [vmem:[#allocation5] sm:$0xff]  ;;  %vm49_vm0 = vcmask 1043456   ;;  %v62_v13 = vlaneseq  ;;  %s174_s1 = smov [#allocation7]  }
  0x27   :  { %v39_v2 = vld [vmem:[#allocation2 + $0x8] sm:$0xff]  ;;  %v41_v3 = vmul.f32 %v40_v1, %v38_v0  ;;  %s83_s6 = sshll.u32 %s174_s1, 4  ;;  %vm72_vm1 = vcmask 1041409   ;;  %vm75_vm2 = vcmask 25600   ;;  %s84_s6 = int_to_ptr.vmem [resolvable:$true] %s83_s6 }
  0x28   :  { %v42_v4 = vmul.f32 %v40_v1, %v39_v2  ;;  %v63_v14 = vand.u32 127, %v62_v13  ;;  %v65_v15 = vshrl.u32 %v62_v13, 7  ;;  %s142_s7 = scalar_lea.vmem %s84_s6, 32  ;;  %p147_p3 = scmp.lt.s32.totalorder %s84_s6, %s84_s6 }
  0x29   :  { %v45_v5 = vcombine.high %v41_v3, %v41_v3  ;;  %v50_v6 = vsel %vm49_vm0, %v41_v3, 0.0  ;;  %p143_p2 = scmp.ne.s32.totalorder %s84_s6, %s142_s7  ;;  %p148_p4 = scmp.lt.s32.totalorder %s142_s7, %s142_s7 }
  0x2a   :  { %v46_v7 = vcombine.high %v42_v4, %v42_v4  ;;  %v55_v9 = vsel %vm49_vm0, %v42_v4, 0.0  ;;  %v66_v17 = vsub.s32 %v63_v14, %v65_v15 }
  0x2b   :  { %v51_v8 = vsel %vm49_vm0, %v45_v5, 0.0  ;;  %p149_p5 = por %p148_p4, %p147_p3 }
  0x2c   :  { %v56_v10 = vsel %vm49_vm0, %v46_v7, 0.0  ;;  %v52_v11 = vadd.f32 %v51_v8, %v50_v6 }
  0x2d   :  { %v57_v12 = vadd.f32 %v56_v10, %v55_v9  ;;  %p150_p6 = pnand %p149_p5, %p143_p2 }
  0x2e   :  { %53 = vadd.xlane.f32.xlu0 %v52_v11 }
  0x32   :  { %58 = vadd.xlane.f32.xlu0 %v57_v12 }
  0xbb   :  { %v54_v16 = vpop.xlane.xlu0 %53 }
  0xbc   :  { %v67_v19 = vrot.slane %v54_v16, %v66_v17 }
  0xbf   :  { %v59_v18 = vpop.xlane.xlu0 %58 }
  0xc0   :  { %v71_v20 = vrot.slane %v59_v18, %v66_v17 }
  0xc2   :  { %v73_v21 = vsel %vm72_vm1, %v71_v20, %v67_v19 }
  0xc3   :  { %76 = vst.msk [vmem:[#allocation7] sm:$0x3] %vm75_vm2, %v73_v21 }
  0xc4   :  { %153 = shalt.err (!%p150_p6)
}
  0xc5   :  { %s154_s10 = scalar_lea.hbm %s228_s2, 32 }
  0xc6   :  { %p155_p7 = scmp.ne.s32.totalorder %s228_s2, %s154_s10  ;;  %p158_p8 = scmp.lt.u32.totalorder %s154_s10, %s228_s2 }
  0xc8   :  { %p160_p9 = pnand %p158_p8, %p155_p7 }
  0xca   :  { %163 = shalt.err (!%p160_p9)
}
  0xcb   :  { %86 = dma.vmem_to_hbm [thread:$0]  %s84_s6, 32, %s228_s2, [#allocation4]  }
  0xcc   :  { %168 = dma.done.wait [#allocation4], 32  }
  0xcd   :  { %169 = vsyncadd [#allocation4], 4294967264 }
  0xce   :  { %90 = vsyncpa [#allocation3], 1 }
  0xcf   :  { %91 = vsyncpa [#allocation6], 1 }
  0xd0   :  { %92 = vsyncpa [#allocation4], 1 }

</bundles_post_ra>
